<compile_context>
chip_gen: v5e
topology: v5e:2x2
jax: 0.10.0
libtpu: 0.0.40
codegen_flags: <defaults>
</compile_context>

<pallas_src>
import math
from functools import partial

import jax
import jax.numpy as jnp
from jax.experimental import pallas as pl
from jax.experimental.pallas import tpu as pltpu

_LANE = 128


def _build_pe(seq_len: int, features: int) -> jnp.ndarray:
    """Positional-encoding table matching the PyTorch __init__ loops exactly."""
    r = jnp.arange(seq_len, dtype=jnp.float32)[:, None]   # sequence position
    c = jnp.arange(features, dtype=jnp.float32)[None, :]  # "pos" in the torch loop
    angle = c / jnp.power(10000.0, 2.0 * r / float(seq_len))
    pe = jnp.where((jnp.arange(seq_len)[:, None] % 2) == 0,
                   jnp.sin(angle), jnp.cos(angle))
    return pe.astype(jnp.float32)                          # (S, F)


def _block_budget_bytes() -> int:
    """Per-generation byte budget for one x/out tile."""
    kind = ""
    try:
        kind = jax.devices()[0].device_kind.lower()
    except Exception:
        pass
    if "v5 lite" in kind or "v5e" in kind or "v5lite" in kind:
        return 3 << 20   # v5e: slower HBM + 16 MiB scoped default -> modest blocks
    if "v7" in kind:
        return 6 << 20   # v7x: 3.2 TB/s HBM -> bigger blocks amortize ~0.35us/step
    return 4 << 20       # v6e and anything unrecognized


def _choose_tiles(batch: int, sf: int, itemsize: int, budget: int) -> tuple[int, int]:
    """Pick (tb, tc) for the flattened (B, S*F) problem.

    Invariants (grid uses cdiv, so nothing needs to divide exactly):
      * tc is a multiple of 128, or the full extent when S*F < 128.
      * tb is a multiple of the dtype's sublane packing (8/16/32), or the full
        batch when B is smaller than one packed sublane group.
      * tb * tc * itemsize <= budget  ->  no VMEM blow-ups for any (B, S, F).
      * >= 2 grid steps whenever the shape legally allows (v7x dual-TC usage).
    """
    sub = max(8, 32 // max(1, itemsize))          # rows per packed sublane group
    if sf < _LANE:
        tc = sf                                   # full extent; tiny, always fits
    else:
        rows_floor = min(batch, sub)
        col_cap = max(_LANE, budget // (rows_floor * itemsize))
        tc = min((col_cap // _LANE) * _LANE, (sf // _LANE) * _LANE)

    if batch <= sub:
        tb = batch                                # full extent (< one packed group)
    else:
        max_rows = max(sub, budget // (tc * itemsize))
        tb = max(sub, min((max_rows // sub) * sub, (batch // sub) * sub))

    def _steps(tb_: int, tc_: int) -> int:
        return (-(-sf // tc_)) * (-(-batch // tb_))

    while _steps(tb, tc) < 2:
        if tc >= 2 * _LANE:
            tc = max(_LANE, (tc // 2 // _LANE) * _LANE)
        elif batch > sub and tb >= 2 * sub:
            tb = max(sub, (tb // 2 // sub) * sub)
        else:
            break                                 # too small to split legally
    return tb, tc


def _pos_enc_kernel(x_ref, pe_ref, o_ref, *, scale: float):
    # x_ref: (TB, TC) in x.dtype   pe_ref: (1, TC) f32, 0.01 pre-folded
    # Pure VPU FMA in f32 (matches torch's f32 pe buffer), cast at the store.
    x = x_ref[...].astype(jnp.float32)
    o_ref[...] = (x * scale + pe_ref[...]).astype(o_ref.dtype)


def positional_encoder(x: jnp.ndarray, pe: jnp.ndarray) -> jnp.ndarray:
    """x: (B, S, F), pe: (S, F) raw table -> (B, S, F), same dtype as x."""
    B, S, F = x.shape
    assert pe.shape == (S, F)
    scale = float(math.sqrt(F))                  # sqrt(self.features)
    SF = S * F
    itemsize = jnp.dtype(x.dtype).itemsize

    # One-time prep outside the hot path: fold 0.01 into the (f32) table and
    # flatten both operands into lane-dense 2-D slabs.
    pe_flat = (0.01 * pe).astype(jnp.float32).reshape(1, SF)
    x_flat = x.reshape(B, SF)

    tb, tc = _choose_tiles(B, SF, itemsize, _block_budget_bytes())

    cost = pl.CostEstimate(
        flops=2 * B * SF,                                   # 1 mul + 1 add / elem
        transcendentals=0,
        bytes_accessed=2 * B * SF * itemsize + SF * 4,      # read x + write out + read pe
    )

    out_flat = pl.pallas_call(
        partial(_pos_enc_kernel, scale=scale),
        out_shape=jax.ShapeDtypeStruct((B, SF), x.dtype),
        grid_spec=pltpu.PrefetchScalarGridSpec(
            num_scalar_prefetch=0,
            # Column (pe-selecting) axis OUTER, batch axis INNER: the pe block
            # index is constant across consecutive inner steps -> pe stays resident.
            grid=(pl.cdiv(SF, tc), pl.cdiv(B, tb)),
            in_specs=[
                pl.BlockSpec((tb, tc), lambda c, b: (b, c)),   # x tile
                pl.BlockSpec((1, tc), lambda c, b: (0, c)),    # pe strip (reused over b)
            ],
            out_specs=pl.BlockSpec((tb, tc), lambda c, b: (b, c)),
        ),
        compiler_params=pltpu.CompilerParams(
            dimension_semantics=("parallel", "parallel"),
            vmem_limit_bytes=48 << 20,
        ),
        cost_estimate=cost,
    )(x_flat, pe_flat)

    return out_flat.reshape(B, S, F)


if __name__ == "__main__":
    # Small shapes consistent with the module (seq_len must be even, as in PyTorch).
    B, S, F = 2, 8, 32

    key = jax.random.PRNGKey(0)
    x = jax.random.normal(key, (B, S, F), dtype=jnp.float32)
    pe = _build_pe(S, F)

    out = jax.block_until_ready(positional_encoder(x, pe))

    # Reference check in plain JAX (same math as the torch forward).
    ref = x * math.sqrt(F) + 0.01 * pe[None, :, :]
    assert out.shape == (B, S, F)
    assert jnp.allclose(out, ref, atol=1e-5, rtol=1e-5)

    print("KERNEL_OK")
</pallas_src>

<mosaic_0001>
module attributes {stable_mosaic.version = 11 : i64} {
  func.func @_pos_enc_kernel(%arg0: i32, %arg1: i32, %arg2: memref<2x128xf32, #tpu.memory_space<vmem>>, %arg3: memref<1x128xf32, #tpu.memory_space<vmem>>, %arg4: memref<2x128xf32, #tpu.memory_space<vmem>>) attributes {dimension_semantics = [#tpu.dimension_semantics<parallel>, #tpu.dimension_semantics<parallel>], iteration_bounds = array<i64: 2, 1>, scalar_prefetch = 0 : i64, scratch_operands = 0 : i64, tpu.core_type = #tpu.core_type<tc>, window_params = [{transform_indices = @transform_0, window_bounds = array<i64: 2, 128>}, {transform_indices = @transform_1, window_bounds = array<i64: 1, 128>}, {transform_indices = @transform_2, window_bounds = array<i64: 2, 128>}]} {
    %c0 = arith.constant 0 : index
    %c0_0 = arith.constant 0 : index
    %0 = vector.load %arg2[%c0, %c0_0] : memref<2x128xf32, #tpu.memory_space<vmem>>, vector<2x128xf32>
    %cst = arith.constant 5.65685415 : f32
    %1 = vector.broadcast %cst : f32 to vector<2x128xf32>
    %2 = arith.mulf %0, %1 : vector<2x128xf32>
    %c0_1 = arith.constant 0 : index
    %c0_2 = arith.constant 0 : index
    %3 = vector.load %arg3[%c0_1, %c0_2] : memref<1x128xf32, #tpu.memory_space<vmem>>, vector<1x128xf32>
    %4 = vector.broadcast %3 : vector<1x128xf32> to vector<2x128xf32>
    %5 = arith.addf %2, %4 : vector<2x128xf32>
    %c0_3 = arith.constant 0 : index
    %c0_4 = arith.constant 0 : index
    %6 = vector.load %arg4[%c0_3, %c0_4] : memref<2x128xf32, #tpu.memory_space<vmem>>, vector<2x128xf32>
    tpu.vector_store %arg4[%c0_3, %c0_4], %5 {strides = array<i32>} : memref<2x128xf32, #tpu.memory_space<vmem>>, vector<2x128xf32>,
    return
  }
  func.func @transform_0(%arg0: i32, %arg1: i32) -> (i32, i32) {
    %c0_i32 = arith.constant 0 : i32
    return %arg1, %arg0 : i32, i32
  }
  func.func @transform_1(%arg0: i32, %arg1: i32) -> (i32, i32) {
    %c0_i32 = arith.constant 0 : i32
    %c0_i32_0 = arith.constant 0 : i32
    return %c0_i32, %arg0 : i32, i32
  }
  func.func @transform_2(%arg0: i32, %arg1: i32) -> (i32, i32) {
    %c0_i32 = arith.constant 0 : i32
    return %arg1, %arg0 : i32, i32
  }
}

</mosaic_0001>

<bundles_post_ra>
// kernel: tpu_custom_call.1
= control target key start
LH: loop header
LB: loop body
LE: loop exit
PB: predicated region body
PF: predicated region fallthrough
CT: control target
= control target key end

     0   :  { %7 = vsyncpa [#allocation3], 0  ;;  %s715_s0 = inlined_call_operand.hbm [shape: f32[2,256], index: 0, kind: input, shape index: {}]   ;;  %s716_s1 = inlined_call_operand.hbm [shape: f32[1,256], index: 1, kind: input, shape index: {}]   ;;  %s717_s2 = inlined_call_operand.hbm [shape: f32[2,256], index: 2, kind: output, shape index: {}]  }
   0x1   :  { %9 = vsyncpa [#allocation3 + $0x1], 0 }
   0x2   :  { %10 = vsyncpa [#allocation6], 0 }
   0x3   :  { %12 = vsyncpa [#allocation6 + $0x1], 0 }
   0x4   :  { %13 = vsyncpa [#allocation4], 0 }
   0x5   :  { %15 = vsyncpa [#allocation4 + $0x1], 0  ;;  %s585_s9 = smov 0   ;;  %s587_s10 = smov 0  }
   0x6   :  { %s589_s11 = smov 0   ;;  %s591_s12 = smov 0  }
   0x7   :  { %s593_s13 = smov 0   ;;  %s595_s14 = smov 0  }
   0x8 LB: > { %s341_s15 = sadd.s32 4294967295, %s568_s14   ;;  %s342_s16 = sadd.s32 4294967294, %s568_s14   ;;  %s568_s14 = sphi %s595_s14, %s21_s14   ;;  %s564_s13 = sphi %s593_s13, %s726_s13   ;;  %s560_s12 = sphi %s591_s12, %s725_s12   ;;  %s556_s11 = sphi %s589_s11, %s724_s11   ;;  %s552_s10 = sphi %s587_s10, %s723_s10   ;;  %s548_s9 = sphi %s585_s9, %s722_s9  }
   0x9   : > { %s33_s17 = sadd.s32 1, %s564_s13  ;;  %s42_s18 = sadd.s32 1, %s556_s11 }
   0xa   : > { %p35_p0 = scmp.ge.s32.totalorder %s33_s17, 2  ;;  %p49_p1 = scmp.ne.s32.totalorder %s556_s11, %s552_s10 }
   0xb   : > { %p50_p2 = scmp.eq.s32.totalorder %s568_s14, 0  ;;  %p55_p3 = scmp.ne.s32.totalorder %s552_s10, %s548_s9 }
   0xc   : > { %s728_s17 = smov (%p35_p0, %s33_s17), 0  ;;  %p56_p5 = scmp.eq.s32.totalorder %s341_s15, 0 }
   0xd   : > { %p626_p4 = por %p50_p2, %p49_p1  ;;  %s38_s20 = ssub.s32 %s564_s13, %s728_s17 }
   0xe   : > { %p107_p6 = scmp.eq.s32.totalorder %s341_s15, 1  ;;  %p40_p7 = scmp.eq.s32.totalorder %s38_s20, 0 }
   0xf   : > { %p632_p8 = por %p56_p5, %p55_p3  ;;  %p113_p10 = scmp.eq.s32.totalorder %s342_s16, 1 }
  0x10   : > { %p636_p9 = por %p107_p6, %p49_p1  ;;  %p344_p12 = scmp.ge.s32.totalorder %s568_s14, 2 }
  0x11   : > { %s641_s23 = scalar_select %p40_p7, %s556_s11, %s42_s18  }
  0x12   : > { %p643_p11 = por %p113_p10, %p55_p3  ;;  %p371_p13 = scmp.lt.s32.totalorder %s568_s14, 2 }
  0x13   : > { %s133_s25 = sand.u32 1, %s556_s11   ;;  %s346_s27 = sshll.u32 %s564_s13, 1 }
  0x14   : > { %s345_s26 = sshll.u32 %s133_s25, 1  ;;  %s143_s30 = scalar_lea.hbm %s715_s0, %s346_s27 }
  0x15   : > { %s137_s3 = scalar_lea.vmem [#allocation2], %s345_s26  ;;  %s145_s5 = sshll.u32 %s143_s30, 4  ;;  %s146_s5 = int_to_ptr.hbm [resolvable:$true] %s145_s5 }
  0x16   : > { %s147_s4 = sshll.u32 %s137_s3, 4  ;;  %p361_p0 = pnand %p371_p13, %p626_p4  ;;  %s148_s4 = int_to_ptr.vmem [resolvable:$true] %s147_s4 }
  0x17   : > { %p347_p1 = scmp.ge.s32.totalorder %s568_s14, 1  ;;  %p169_p2 = scmp.lt.s32.totalorder %s568_s14, 3 }
  0x18   : > { %s134_s6 = scalar_lea.sflag [#allocation3], %s133_s25  ;;  %s160_s15 = scalar_lea.hbm %s716_s1, %s564_s13 }
  0x19   : > { %363 = dma.hbm_to_vmem [thread:$0]  (!%p361_p0), %s146_s5, 32, %s148_s4, %s134_s6  }
  0x1a   : > { %p170_p3 = pnand %p347_p1, %p169_p2  ;;  %s157_s16 = scalar_lea.vmem [#allocation5], %s133_s25 }
  0x1b   : > { %s164_s18 = sshll.u32 %s157_s16, 4  ;;  %s162_s20 = sshll.u32 %s160_s15, 4  ;;  %s165_s18 = int_to_ptr.vmem [resolvable:$true] %s164_s18  ;;  %s163_s20 = int_to_ptr.hbm [resolvable:$true] %s162_s20 }
  0x1c   : > { %s155_s26 = scalar_lea.sflag [#allocation6], %s133_s25  ;;  %173 = sbr.rel (%p170_p3) target bundleno = 51 (0x33), region = 28 }
  0x1d   : > { %366 = dma.hbm_to_vmem [thread:$0]  (!%p361_p0), %s163_s20, 16, %s165_s18, %s155_s26  }
  0x1e   : > { %s663_s19 = sand.u32 (!%p170_p3), 1, %s552_s10  }
  0x1f   : > { %s348_s27 = sshll.u32 (!%p170_p3), %s663_s19, 1  ;;  %s176_s28 = scalar_lea.sflag (!%p170_p3), [#allocation3], %s663_s19 }
  0x20   : > { %s179_s29 = scalar_lea.vmem (!%p170_p3), [#allocation2], %s348_s27 }
  0x21   : > { %535 = dma.done.wait (%p632_p8), %s176_s28, 32  }
  0x22   : > { %537 = vsyncadd (%p632_p8), %s176_s28, 4294967264  ;;  %s186_s25 = scalar_lea.sflag [#allocation6], %s663_s19  ;;  %s188_s30 = scalar_lea.vmem [#allocation5], %s663_s19 }
  0x23   : > { %539 = dma.done.wait (%p632_p8), %s186_s25, 16  }
  0x24   : > { %541 = vsyncadd (%p632_p8), %s186_s25, 4294967280  ;;  %s351_s3 = sshll.u32 %s560_s12, 1  ;;  %s213_s7 = scalar_lea.vmem [#allocation7], %s348_s27  ;;  %v214_v0 = vld [vmem:[%s179_s29] sm:$0x3] }
  0x25   : > { %s235_s6 = scalar_lea.hbm %s717_s2, %s351_s3  ;;  %s237_s8 = sshll.u32 %s213_s7, 4  ;;  %v421_v1 = vld [vmem:[%s188_s30] ss:$0 sm:$0xff]  ;;  %v215_v2 = vmul.f32 5.656854, %v214_v0  ;;  %s238_s8 = int_to_ptr.vmem [resolvable:$true] %s237_s8 }
  0x26   : > { %s239_s15 = sshll.u32 %s235_s6, 4  ;;  %s223_s21 = scalar_lea.sflag [#allocation4], %s663_s19  ;;  %s240_s15 = int_to_ptr.hbm [resolvable:$true] %s239_s15 }
  0x27   : > { %v220_v3 = vadd.f32 %v421_v1, %v215_v2  ;;  %s496_s16 = sshra.s32 %s240_s15, 4  ;;  %s502_s26 = scalar_lea.hbm %s717_s2, 4  ;;  %s497_s16 = int_to_ptr.hbm [resolvable:$true] %s496_s16 }
  0x28   : > { %s498_s18 = scalar_lea.hbm %s497_s16, 2  ;;  %p503_p7 = scmp.lt.s32.totalorder %s497_s16, %s717_s2 }
  0x29   : > { %221 = vst [vmem:[%s213_s7] sm:$0x3] %v220_v3  ;;  %p499_p4 = scmp.ne.s32.totalorder %s497_s16, %s498_s18  ;;  %p504_p8 = scmp.lt.s32.totalorder %s502_s26, %s498_s18 }
  0x2b   : > { %p500_p5 = pnand %p499_p4, %p636_p9  ;;  %p505_p10 = por %p504_p8, %p503_p7 }
  0x2d   : > { %p501_p6 = pneg %p500_p5 }
  0x2f   : > { %p506_p13 = pnand %p505_p10, %p501_p6 }
  0x31   : > { %509 = shalt.err (!%p506_p13)
}
  0x32   : > { %358 = dma.vmem_to_hbm [thread:$0]  (%p636_p9), %s238_s8, 32, %s240_s15, %s223_s21  }
  0x33 PF: > { %s251_s19 = sand.u32 1, %s548_s9   ;;  %p368_p0 = pnand %p344_p12, %p643_p11 }
  0x34   : > { %s252_s29 = scalar_lea.sflag [#allocation4], %s251_s19 }
  0x35   : > { %p369_p1 = pneg %p368_p0 }
  0x37   : > { %543 = dma.done.wait (%p369_p1), %s252_s29, 32  }
  0x38   : > { %545 = vsyncadd (%p369_p1), %s252_s29, 4294967264  ;;  %s21_s14 = sadd.s32 1, %s568_s14   ;;  %s722_s9 = smov %s552_s10 }
  0x39   : > { %p18_p2 = scmp.ge.s32.totalorder %s21_s14, 4   ;;  %s723_s10 = smov %s556_s11 }
  0x3a   : > { %s724_s11 = smov %s641_s23  ;;  %s725_s12 = smov %s564_s13 }
  0x3b   : > { %s726_s13 = smov %s728_s17  ;;  %20 = sbr.rel (!%p18_p2) target bundleno = 8 (0x8), region = 86 }
  0x40   :  { %258 = vsyncpa [#allocation3], 1 }
  0x41   :  { %260 = vsyncpa [#allocation3 + $0x1], 1 }
  0x42   :  { %261 = vsyncpa [#allocation6], 1 }
  0x43   :  { %263 = vsyncpa [#allocation6 + $0x1], 1 }
  0x44   :  { %264 = vsyncpa [#allocation4], 1 }
  0x45   :  { %266 = vsyncpa [#allocation4 + $0x1], 1 }

</bundles_post_ra>
